<compile_context>
chip_gen: v7x
topology: tpu7x:2x2x1
jax: 0.10.0
libtpu: 0.0.40
codegen_flags: <defaults>
</compile_context>

<pallas_src>
import jax
import jax.numpy as jnp
from jax.experimental import pallas as pl
from jax.experimental.pallas import tpu as pltpu


def attention_kernel(x_ref, whT_ref, whb_ref, vT_ref, vb_ref, out_ref,
                     m_ref, d_ref, acc_ref):
    s = pl.program_id(0)

    @pl.when(s == 0)
    def _init():
        m_ref[...] = jnp.full_like(m_ref, -jnp.inf)
        d_ref[...] = jnp.zeros_like(d_ref)
        acc_ref[...] = jnp.zeros_like(acc_ref)

    x = x_ref[...]                                            # (TS, H) native dtype

    # Linear 1 + sigmoid. Weight already transposed -> direct MXU feed,
    # f32 accumulation via preferred_element_type (no operand upcast).
    h = jnp.dot(x, whT_ref[...], preferred_element_type=jnp.float32)
    h = jax.nn.sigmoid(h + whb_ref[...].astype(jnp.float32))  # (TS, H) f32

    # Linear 2: cast back to the MXU input dtype, accumulate in f32.
    a = jnp.dot(h.astype(x.dtype), vT_ref[...],
                preferred_element_type=jnp.float32)
    a = a + vb_ref[...].astype(jnp.float32)                   # (TS, H) f32

    # Online softmax over the sequence axis (per hidden column).
    m_old = m_ref[...]                                        # (1, H)
    m_new = jnp.maximum(m_old, jnp.max(a, axis=0, keepdims=True))
    corr = jnp.exp(m_old - m_new)                             # (1, H)
    e = jnp.exp(a - m_new)                                    # (TS, H)
    d_ref[...] = corr * d_ref[...] + jnp.sum(e, axis=0, keepdims=True)
    acc_ref[...] = corr * acc_ref[...] + jnp.sum(
        e * x.astype(jnp.float32), axis=0, keepdims=True)
    m_ref[...] = m_new

    @pl.when(s == pl.num_programs(0) - 1)
    def _finalize():
        out = acc_ref[...] * pl.reciprocal(d_ref[...], approx=True)
        out_ref[...] = out.astype(out_ref.dtype)


def _choose_seq_tile(S, max_tile):
    """Largest sequence tile <= max_tile that divides S (8-aligned when tiled)."""
    if S <= max_tile:
        return S
    ts = max_tile - (max_tile % 8)
    while ts > 8 and S % ts != 0:
        ts -= 8
    if ts <= 0 or S % ts != 0:
        # TODO(synk): pad/mask a ragged final tile instead of requiring divisibility.
        raise ValueError(f"sequence length {S} has no 8-aligned tile <= {max_tile}")
    return ts


def attention_forward(x, wh_w, wh_b, v_w, v_b, *, max_seq_tile=1024):
    S, H = x.shape
    # Pre-transpose the PyTorch-layout (out, in) weights on the wrapper side so
    # the kernel never runs an XLU transpose: y = x @ W^T  ->  x @ W_t.
    wh_wT = wh_w.T                      # (in, out)
    v_wT = v_w.T
    wh_b2 = wh_b.reshape(1, H)
    v_b2 = v_b.reshape(1, H)

    ts = _choose_seq_tile(S, max_seq_tile)
    num_tiles = S // ts

    grid_spec = pltpu.PrefetchScalarGridSpec(
        num_scalar_prefetch=0,
        grid=(num_tiles,),
        in_specs=[
            pl.BlockSpec((ts, H), lambda s: (s, 0)),   # x streamed over seq
            pl.BlockSpec((H, H), lambda s: (0, 0)),    # Wh^T resident
            pl.BlockSpec((1, H), lambda s: (0, 0)),    # b_wh resident
            pl.BlockSpec((H, H), lambda s: (0, 0)),    # V^T resident
            pl.BlockSpec((1, H), lambda s: (0, 0)),    # b_v resident
        ],
        out_specs=pl.BlockSpec((1, H), lambda s: (0, 0)),
        scratch_shapes=[
            pltpu.VMEM((1, H), jnp.float32),   # running max
            pltpu.VMEM((1, H), jnp.float32),   # running denom
            pltpu.VMEM((1, H), jnp.float32),   # running weighted accumulator
        ],
    )

    return pl.pallas_call(
        attention_kernel,
        out_shape=jax.ShapeDtypeStruct((1, H), x.dtype),
        grid_spec=grid_spec,
        compiler_params=pltpu.CompilerParams(
            dimension_semantics=("arbitrary",),     # sequence axis is a reduction
            vmem_limit_bytes=32 * 1024 * 1024,      # within scoped limits on v5e/v6e/v7x
        ),
    )(x, wh_wT, wh_b2, v_wT, v_b2)


def reference_forward(x, wh_w, wh_b, v_w, v_b):
    h = jax.nn.sigmoid(x @ wh_w.T + wh_b)
    a = h @ v_w.T + v_b
    a = jax.nn.softmax(a, axis=0)
    return jnp.sum(a * x, axis=0, keepdims=True)


if __name__ == "__main__":
    S, H = 256, 32   # sequence length, hidden dim (h_dim of the module)

    key = jax.random.PRNGKey(0)
    k_x, k_ww, k_wb, k_vw, k_vb = jax.random.split(key, 5)

    # Deterministic parameter init (uniform, like nn.Linear's default scheme)
    bound = 1.0 / (H ** 0.5)
    x = jax.random.normal(k_x, (S, H), dtype=jnp.float32)
    wh_w = jax.random.uniform(k_ww, (H, H), minval=-bound, maxval=bound, dtype=jnp.float32)
    wh_b = jax.random.uniform(k_wb, (H,), minval=-bound, maxval=bound, dtype=jnp.float32)
    v_w = jax.random.uniform(k_vw, (H, H), minval=-bound, maxval=bound, dtype=jnp.float32)
    v_b = jax.random.uniform(k_vb, (H,), minval=-bound, maxval=bound, dtype=jnp.float32)

    # max_seq_tile=64 -> 4-step grid: exercises init / online update / finalize.
    out = attention_forward(x, wh_w, wh_b, v_w, v_b, max_seq_tile=64)
    jax.block_until_ready(out)

    ref = reference_forward(x, wh_w, wh_b, v_w, v_b)
    assert out.shape == (1, H)
    assert jnp.allclose(out, ref, atol=1e-3, rtol=1e-3), (out, ref)

    print("KERNEL_OK")
</pallas_src>

<mosaic_0001>
module attributes {stable_mosaic.version = 11 : i64} {
  func.func @attention_kernel(%arg0: i32, %arg1: memref<64x32xf32, #tpu.memory_space<vmem>>, %arg2: memref<32x32xf32, #tpu.memory_space<vmem>>, %arg3: memref<1x32xf32, #tpu.memory_space<vmem>>, %arg4: memref<32x32xf32, #tpu.memory_space<vmem>>, %arg5: memref<1x32xf32, #tpu.memory_space<vmem>>, %arg6: memref<1x32xf32, #tpu.memory_space<vmem>>, %arg7: memref<1x32xf32, #tpu.memory_space<vmem>>, %arg8: memref<1x32xf32, #tpu.memory_space<vmem>>, %arg9: memref<1x32xf32, #tpu.memory_space<vmem>>) attributes {dimension_semantics = [#tpu.dimension_semantics<arbitrary>], iteration_bounds = array<i64: 4>, scalar_prefetch = 0 : i64, scratch_operands = 3 : i64, tpu.core_type = #tpu.core_type<tc>, window_params = [{transform_indices = @transform_0, window_bounds = array<i64: 64, 32>}, {pipeline_mode = #tpu.pipeline_mode<synchronous>, transform_indices = @transform_1, window_bounds = array<i64: 32, 32>}, {pipeline_mode = #tpu.pipeline_mode<synchronous>, transform_indices = @transform_2, window_bounds = array<i64: 1, 32>}, {pipeline_mode = #tpu.pipeline_mode<synchronous>, transform_indices = @transform_3, window_bounds = array<i64: 32, 32>}, {pipeline_mode = #tpu.pipeline_mode<synchronous>, transform_indices = @transform_4, window_bounds = array<i64: 1, 32>}, {pipeline_mode = #tpu.pipeline_mode<synchronous>, transform_indices = @transform_5, window_bounds = array<i64: 1, 32>}]} {
    %c0_i32 = arith.constant 0 : i32
    %0 = arith.cmpi eq, %arg0, %c0_i32 : i32
    %1 = arith.extui %0 : i1 to i32
    %c0_i32_0 = arith.constant 0 : i32
    %2 = arith.cmpi ne, %1, %c0_i32_0 : i32
    scf.if %2 {
      %cst_28 = arith.constant 0xFF800000 : f32
      %45 = vector.broadcast %cst_28 : f32 to vector<1x32xf32>
      %c0_29 = arith.constant 0 : index
      %c0_30 = arith.constant 0 : index
      %46 = vector.load %arg7[%c0_29, %c0_30] : memref<1x32xf32, #tpu.memory_space<vmem>>, vector<1x32xf32>
      tpu.vector_store %arg7[%c0_29, %c0_30], %45 {strides = array<i32>} : memref<1x32xf32, #tpu.memory_space<vmem>>, vector<1x32xf32>,
      %cst_31 = arith.constant 0.000000e+00 : f32
      %47 = vector.broadcast %cst_31 : f32 to vector<1x32xf32>
      %c0_32 = arith.constant 0 : index
      %c0_33 = arith.constant 0 : index
      %48 = vector.load %arg8[%c0_32, %c0_33] : memref<1x32xf32, #tpu.memory_space<vmem>>, vector<1x32xf32>
      tpu.vector_store %arg8[%c0_32, %c0_33], %47 {strides = array<i32>} : memref<1x32xf32, #tpu.memory_space<vmem>>, vector<1x32xf32>,
      %cst_34 = arith.constant 0.000000e+00 : f32
      %49 = vector.broadcast %cst_34 : f32 to vector<1x32xf32>
      %c0_35 = arith.constant 0 : index
      %c0_36 = arith.constant 0 : index
      %50 = vector.load %arg9[%c0_35, %c0_36] : memref<1x32xf32, #tpu.memory_space<vmem>>, vector<1x32xf32>
      tpu.vector_store %arg9[%c0_35, %c0_36], %49 {strides = array<i32>} : memref<1x32xf32, #tpu.memory_space<vmem>>, vector<1x32xf32>,
    } else {
    }
    %c0 = arith.constant 0 : index
    %c0_1 = arith.constant 0 : index
    %3 = vector.load %arg1[%c0, %c0_1] : memref<64x32xf32, #tpu.memory_space<vmem>>, vector<64x32xf32>
    %c0_2 = arith.constant 0 : index
    %c0_3 = arith.constant 0 : index
    %4 = vector.load %arg2[%c0_2, %c0_3] : memref<32x32xf32, #tpu.memory_space<vmem>>, vector<32x32xf32>
    %cst = arith.constant dense<0.000000e+00> : vector<64x32xf32>
    %5 = tpu.matmul %3, %4, %cst {dimension_numbers = #tpu.dot_dimension_numbers<[1], [0], [0], [1], [0, 0, 1, 1], [], []>} : vector<64x32xf32>, vector<32x32xf32>, vector<64x32xf32> -> vector<64x32xf32>
    %c0_4 = arith.constant 0 : index
    %c0_5 = arith.constant 0 : index
    %6 = vector.load %arg3[%c0_4, %c0_5] : memref<1x32xf32, #tpu.memory_space<vmem>>, vector<1x32xf32>
    %7 = vector.broadcast %6 : vector<1x32xf32> to vector<64x32xf32>
    %8 = arith.addf %5, %7 : vector<64x32xf32>
    %9 = arith.negf %8 : vector<64x32xf32>
    %10 = math.exp %9 : vector<64x32xf32>
    %cst_6 = arith.constant 1.000000e+00 : f32
    %11 = vector.broadcast %cst_6 : f32 to vector<64x32xf32>
    %12 = arith.addf %11, %10 : vector<64x32xf32>
    %13 = arith.divf %11, %12 : vector<64x32xf32>
    %c0_7 = arith.constant 0 : index
    %c0_8 = arith.constant 0 : index
    %14 = vector.load %arg4[%c0_7, %c0_8] : memref<32x32xf32, #tpu.memory_space<vmem>>, vector<32x32xf32>
    %cst_9 = arith.constant dense<0.000000e+00> : vector<64x32xf32>
    %15 = tpu.matmul %13, %14, %cst_9 {dimension_numbers = #tpu.dot_dimension_numbers<[1], [0], [0], [1], [0, 0, 1, 1], [], []>} : vector<64x32xf32>, vector<32x32xf32>, vector<64x32xf32> -> vector<64x32xf32>
    %c0_10 = arith.constant 0 : index
    %c0_11 = arith.constant 0 : index
    %16 = vector.load %arg5[%c0_10, %c0_11] : memref<1x32xf32, #tpu.memory_space<vmem>>, vector<1x32xf32>
    %17 = vector.broadcast %16 : vector<1x32xf32> to vector<64x32xf32>
    %18 = arith.addf %15, %17 : vector<64x32xf32>
    %c0_12 = arith.constant 0 : index
    %c0_13 = arith.constant 0 : index
    %19 = vector.load %arg7[%c0_12, %c0_13] : memref<1x32xf32, #tpu.memory_space<vmem>>, vector<1x32xf32>
    %cst_14 = arith.constant dense<0xFF800000> : vector<32xf32>
    %20 = vector.multi_reduction <maximumf>, %18, %cst_14 [0] : vector<64x32xf32> to vector<32xf32>
    %21 = vector.shape_cast %20 : vector<32xf32> to vector<1x32xf32>
    %22 = arith.maximumf %19, %21 : vector<1x32xf32>
    %23 = arith.subf %19, %22 : vector<1x32xf32>
    %24 = math.exp %23 : vector<1x32xf32>
    %25 = vector.broadcast %22 : vector<1x32xf32> to vector<64x32xf32>
    %26 = arith.subf %18, %25 : vector<64x32xf32>
    %27 = math.exp %26 : vector<64x32xf32>
    %c0_15 = arith.constant 0 : index
    %c0_16 = arith.constant 0 : index
    %28 = vector.load %arg8[%c0_15, %c0_16] : memref<1x32xf32, #tpu.memory_space<vmem>>, vector<1x32xf32>
    %29 = arith.mulf %24, %28 : vector<1x32xf32>
    %cst_17 = arith.constant dense<0.000000e+00> : vector<32xf32>
    %30 = vector.multi_reduction <add>, %27, %cst_17 [0] : vector<64x32xf32> to vector<32xf32>
    %31 = vector.shape_cast %30 : vector<32xf32> to vector<1x32xf32>
    %32 = arith.addf %29, %31 : vector<1x32xf32>
    %c0_18 = arith.constant 0 : index
    %c0_19 = arith.constant 0 : index
    %33 = vector.load %arg8[%c0_18, %c0_19] : memref<1x32xf32, #tpu.memory_space<vmem>>, vector<1x32xf32>
    tpu.vector_store %arg8[%c0_18, %c0_19], %32 {strides = array<i32>} : memref<1x32xf32, #tpu.memory_space<vmem>>, vector<1x32xf32>,
    %c0_20 = arith.constant 0 : index
    %c0_21 = arith.constant 0 : index
    %34 = vector.load %arg9[%c0_20, %c0_21] : memref<1x32xf32, #tpu.memory_space<vmem>>, vector<1x32xf32>
    %35 = arith.mulf %24, %34 : vector<1x32xf32>
    %36 = arith.mulf %27, %3 : vector<64x32xf32>
    %cst_22 = arith.constant dense<0.000000e+00> : vector<32xf32>
    %37 = vector.multi_reduction <add>, %36, %cst_22 [0] : vector<64x32xf32> to vector<32xf32>
    %38 = vector.shape_cast %37 : vector<32xf32> to vector<1x32xf32>
    %39 = arith.addf %35, %38 : vector<1x32xf32>
    %c0_23 = arith.constant 0 : index
    %c0_24 = arith.constant 0 : index
    %40 = vector.load %arg9[%c0_23, %c0_24] : memref<1x32xf32, #tpu.memory_space<vmem>>, vector<1x32xf32>
    tpu.vector_store %arg9[%c0_23, %c0_24], %39 {strides = array<i32>} : memref<1x32xf32, #tpu.memory_space<vmem>>, vector<1x32xf32>,
    %c0_25 = arith.constant 0 : index
    %c0_26 = arith.constant 0 : index
    %41 = vector.load %arg7[%c0_25, %c0_26] : memref<1x32xf32, #tpu.memory_space<vmem>>, vector<1x32xf32>
    tpu.vector_store %arg7[%c0_25, %c0_26], %22 {strides = array<i32>} : memref<1x32xf32, #tpu.memory_space<vmem>>, vector<1x32xf32>,
    %c3_i32 = arith.constant 3 : i32
    %42 = arith.cmpi eq, %arg0, %c3_i32 : i32
    %43 = arith.extui %42 : i1 to i32
    %c0_i32_27 = arith.constant 0 : i32
    %44 = arith.cmpi ne, %43, %c0_i32_27 : i32
    scf.if %44 {
      %c0_28 = arith.constant 0 : index
      %c0_29 = arith.constant 0 : index
      %45 = vector.load %arg9[%c0_28, %c0_29] : memref<1x32xf32, #tpu.memory_space<vmem>>, vector<1x32xf32>
      %c0_30 = arith.constant 0 : index
      %c0_31 = arith.constant 0 : index
      %46 = vector.load %arg8[%c0_30, %c0_31] : memref<1x32xf32, #tpu.memory_space<vmem>>, vector<1x32xf32>
      %47 = tpu.reciprocal %46 {approx = true} : vector<1x32xf32> -> vector<1x32xf32>
      %48 = arith.mulf %45, %47 : vector<1x32xf32>
      %c0_32 = arith.constant 0 : index
      %c0_33 = arith.constant 0 : index
      %49 = vector.load %arg6[%c0_32, %c0_33] : memref<1x32xf32, #tpu.memory_space<vmem>>, vector<1x32xf32>
      tpu.vector_store %arg6[%c0_32, %c0_33], %48 {strides = array<i32>} : memref<1x32xf32, #tpu.memory_space<vmem>>, vector<1x32xf32>,
    } else {
    }
    return
  }
  func.func @transform_0(%arg0: i32) -> (i32, i32) {
    %c0_i32 = arith.constant 0 : i32
    %c0_i32_0 = arith.constant 0 : i32
    return %arg0, %c0_i32 : i32, i32
  }
  func.func @transform_1(%arg0: i32) -> (i32, i32) {
    %c0_i32 = arith.constant 0 : i32
    %c0_i32_0 = arith.constant 0 : i32
    %c0_i32_1 = arith.constant 0 : i32
    return %c0_i32, %c0_i32_0 : i32, i32
  }
  func.func @transform_2(%arg0: i32) -> (i32, i32) {
    %c0_i32 = arith.constant 0 : i32
    %c0_i32_0 = arith.constant 0 : i32
    %c0_i32_1 = arith.constant 0 : i32
    return %c0_i32, %c0_i32_0 : i32, i32
  }
  func.func @transform_3(%arg0: i32) -> (i32, i32) {
    %c0_i32 = arith.constant 0 : i32
    %c0_i32_0 = arith.constant 0 : i32
    %c0_i32_1 = arith.constant 0 : i32
    return %c0_i32, %c0_i32_0 : i32, i32
  }
  func.func @transform_4(%arg0: i32) -> (i32, i32) {
    %c0_i32 = arith.constant 0 : i32
    %c0_i32_0 = arith.constant 0 : i32
    %c0_i32_1 = arith.constant 0 : i32
    return %c0_i32, %c0_i32_0 : i32, i32
  }
  func.func @transform_5(%arg0: i32) -> (i32, i32) {
    %c0_i32 = arith.constant 0 : i32
    %c0_i32_0 = arith.constant 0 : i32
    %c0_i32_1 = arith.constant 0 : i32
    return %c0_i32, %c0_i32_0 : i32, i32
  }
}

</mosaic_0001>

<bundles_post_ra>
// kernel: tpu_custom_call.1
= control target key start
LH: loop header
LB: loop body
LE: loop exit
PB: predicated region body
PF: predicated region fallthrough
CT: control target
= control target key end

     0   :  { %10 = vsyncpa [#allocation6], 0  ;;  %s987_s18 = smov 0   ;;  %s1145_s0 = inlined_call_operand.vmem [shape: f32[256,32], index: 0, kind: input, shape index: {}]   ;;  %s1146_s1 = inlined_call_operand.vmem [shape: f32[32,32], index: 1, kind: input, shape index: {}]   ;;  %s1147_s2 = inlined_call_operand.vmem [shape: f32[1,32], index: 2, kind: input, shape index: {}]   ;;  %s1148_s3 = inlined_call_operand.vmem [shape: f32[32,32], index: 3, kind: input, shape index: {}]   ;;  %s1149_s4 = inlined_call_operand.vmem [shape: f32[1,32], index: 4, kind: input, shape index: {}]   ;;  %s1150_s5 = inlined_call_operand.hbm [shape: f32[1,32], index: 5, kind: output, shape index: {}]  }
   0x1 LB: > { %s993_s19 = sadd.s32 4294967295, %s952_s18   ;;  %p732_p0 = scmp.ge.s32.totalorder %s952_s18, 1  ;;  %s952_s18 = sphi %s987_s18, %s16_s18  }
   0x2   : > { %p184_p1 = scmp.lt.s32.totalorder %s952_s18, 5 }
   0x4   : > { %p185_p2 = pnand %p732_p0, %p184_p1 }
   0x5   : > { %s733_s20 = sshll.u32 (!%p185_p2), %s993_s19, 3  ;;  %p735_p4 = scmp.ne.s32.totalorder (!%p185_p2), %s993_s19, 0 }
   0x6   : > { %188 = sbr.rel (%p185_p2) target bundleno = 617 (0x269), region = 40  ;;  %p208_p3 = scmp.lt.s32.totalorder (!%p185_p2), %s733_s20, 31 }
   0xd   : > { %s1152_s20 = smov (!%p208_p3, %s733_s20), 31  ;;  %216 = sbr.rel (%p735_p4) target bundleno = 20 (0x14), region = 44 }
   0xe   : > { %s734_s21 = sshll.u32 %s1152_s20, 3  ;;  %vm217_vm0 = vcmask (!%p735_p4), 253952   ;;  %v954_v0 = vmov (!%p735_p4), -inf   ;;  %v955_v1 = vmov (!%p735_p4), 0.0  }
   0xf   : > { %s1001_s24 = scalar_lea.vmem %s1145_s0, %s734_s21  ;;  %218 = vst.msk [vmem:[#allocation2] sm:$0x1] (!%p735_p4), %vm217_vm0, %v954_v0  ;;  %219 = vst.msk [vmem:[#allocation3] sm:$0x1] (!%p735_p4), %vm217_vm0, %v955_v1 }
  0x10   : > { %220 = vst.msk [vmem:[#allocation4] sm:$0x1] (!%p735_p4), %vm217_vm0, %v955_v1 }
  0x14 PF: > { %v229_v2 = vld [vmem:[%s1146_s1] sm:$0xff]  ;;  %v230_v3 = vld [vmem:[%s1146_s1 + $0x8] sm:$0xff]  ;;  %v231_v4 = vld [vmem:[%s1146_s1 + $0x10] sm:$0xff]  ;;  %vm240_vm1 = vcmask 261120   ;;  %vm638_vm2 = vcmask 253952   ;;  %p762_p5 = scmp.ne.s32.totalorder %s993_s19, 3 }
  0x15   : > { %v831_v5 = vpack.c.bf16 %v230_v3, %v229_v2  ;;  %v232_v6 = vld [vmem:[%s1146_s1 + $0x18] sm:$0xff]  ;;  %v1017_v7 = vld [vmem:[%s1001_s24] sm:$0xff]  ;;  %v1022_v9 = vld [vmem:[%s1001_s24 + $0x8] sm:$0xff] }
  0x16   : > { %v835_v8 = vpack.c.bf16 %v232_v6, %v231_v4  ;;  %799 = vmatprep.mubr.msk.f32.mxu0 %vm240_vm1, %v1017_v7  ;;  %v1025_v10 = vld [vmem:[%s1001_s24 + $0x10] sm:$0xff]  ;;  %v1032_v11 = vld [vmem:[%s1001_s24 + $0x18] sm:$0xff]  ;;  %v1035_v12 = vld [vmem:[%s1001_s24 + $0x20] sm:$0xff] }
  0x17   : > { %832 = vmatprep.subr.bf16.mxu0 %v831_v5  ;;  %v1042_v13 = vld [vmem:[%s1001_s24 + $0x28] sm:$0xff]  ;;  %v1045_v14 = vld [vmem:[%s1001_s24 + $0x30] sm:$0xff]  ;;  %v1052_v15 = vld [vmem:[%s1001_s24 + $0x38] sm:$0xff] }
  0x18   : > { %834 = vmatpush3.bf16.msra.mxu0 %v831_v5  ;;  %v418_v16 = vld [vmem:[%s1148_s3] sm:$0xff]  ;;  %v419_v17 = vld [vmem:[%s1148_s3 + $0x8] sm:$0xff]  ;;  %v420_v19 = vld [vmem:[%s1148_s3 + $0x10] sm:$0xff] }
  0x19   : > { %836 = vmatprep.subr.bf16.mxu0 %v835_v8  ;;  %v839_v18 = vpack.c.bf16 %v419_v17, %v418_v16  ;;  %v421_v20 = vld [vmem:[%s1148_s3 + $0x18] sm:$0xff]  ;;  %v736_v22 = vld [vmem:[%s1147_s2] ss:$0 sm:$0xff] }
  0x1a   : > { %v843_v21 = vpack.c.bf16 %v421_v20, %v420_v19  ;;  %v753_v17 = vld [vmem:[%s1149_s4] ss:$0 sm:$0xff] }
  0x1b   : > { %840 = vmatprep.subr.bf16.mxu1 %v839_v18 }
  0x1c   : > { %838 = vmatpush3.bf16.msra.mxu0 %v835_v8  ;;  %842 = vmatpush3.bf16.msra.mxu1 %v839_v18 }
  0x1d   : > { %844 = vmatprep.subr.bf16.mxu1 %v843_v21 }
  0x1f   : > { %800 = vmatmul.mubr.msk.f32.vlgmr.msra.gmra.mrb[0].mxu0 %vm240_vm1, %v1022_v9 }
  0x20   : > { %802 = vmatprep.mubr.msk.f32.mxu0 %vm240_vm1, %v1025_v10  ;;  %846 = vmatpush3.bf16.msra.mxu1 %v843_v21 }
  0x23   : > { %803 = vmatmul.mubr.msk.f32.gmra.mrb[2].mxu0 %vm240_vm1, %v1032_v11 }
  0x24   : > { %805 = vmatprep.mubr.msk.f32.mxu0 %vm240_vm1, %v1035_v12 }
  0x27   : > { %806 = vmatmul.mubr.msk.f32.gmra.mrb[4].mxu0 %vm240_vm1, %v1042_v13 }
  0x28   : > { %808 = vmatprep.mubr.msk.f32.mxu0 %vm240_vm1, %v1045_v14 }
  0x2b   : > { %809 = vmatmul.mubr.msk.f32.gmra.mrb[6].mxu0 %vm240_vm1, %v1052_v15 }
  0xf2   : > { %v801_v23 = vpop.f32.mrb[0].mxu0 }
  0xf3   : > { %v337_v24 = vadd.f32 %v801_v23, %v736_v22  ;;  %v331_v25 = vpop.f32.mrb[1].mxu0 }
  0xf4   : > { %v332_v26 = vadd.f32 %v736_v22, %v331_v25 }
  0xf5   : > { %v746_v27 = vmul.f32 -1.442695, %v337_v24 }
  0xf6   : > { %v745_v28 = vmul.f32 -1.442695, %v332_v26  ;;  %v804_v29 = vpop.f32.mrb[2].mxu0 }
  0xf7   : > { %864 = vpow2.f32 %v746_v27  ;;  %v347_v30 = vadd.f32 %v804_v29, %v736_v22  ;;  %v341_v31 = vpop.f32.mrb[3].mxu0 }
  0xf8   : > { %866 = vpow2.f32 %v745_v28  ;;  %v342_v32 = vadd.f32 %v736_v22, %v341_v31 }
  0xf9   : > { %v748_v33 = vmul.f32 -1.442695, %v347_v30 }
  0xfa   : > { %v747_v34 = vmul.f32 -1.442695, %v342_v32  ;;  %v807_v35 = vpop.f32.mrb[4].mxu0 }
  0xfb   : > { %868 = vpow2.f32 %v748_v33  ;;  %v357_v36 = vadd.f32 %v807_v35, %v736_v22  ;;  %v351_v37 = vpop.f32.mrb[5].mxu0 }
  0xfc   : > { %870 = vpow2.f32 %v747_v34  ;;  %v352_v38 = vadd.f32 %v736_v22, %v351_v37 }
  0xfd   : > { %v750_v39 = vmul.f32 -1.442695, %v357_v36 }
  0xfe   : > { %v749_v40 = vmul.f32 -1.442695, %v352_v38  ;;  %v810_v41 = vpop.f32.mrb[6].mxu0 }
  0xff   : > { %872 = vpow2.f32 %v750_v39  ;;  %v367_v42 = vadd.f32 %v810_v41, %v736_v22  ;;  %v361_v43 = vpop.f32.mrb[7].mxu0 }
 0x100   : > { %874 = vpow2.f32 %v749_v40  ;;  %v362_v44 = vadd.f32 %v736_v22, %v361_v43 }
 0x101   : > { %v865_v45 = vpop.eup %864  ;;  %v752_v46 = vmul.f32 -1.442695, %v367_v42 }
 0x102   : > { %v867_v47 = vpop.eup %866  ;;  %v395_v48 = vadd.f32 1.0, %v865_v45  ;;  %v751_v49 = vmul.f32 -1.442695, %v362_v44 }
 0x103   : > { %v394_v50 = vadd.f32 1.0, %v867_v47  ;;  %876 = vpow2.f32 %v752_v46 }
 0x104   : > { %878 = vrcp.f32 %v395_v48 }
 0x105   : > { %v869_v51 = vpop.eup %868  ;;  %880 = vrcp.f32 %v394_v50 }
 0x106   : > { %v871_v52 = vpop.eup %870  ;;  %v397_v53 = vadd.f32 1.0, %v869_v51  ;;  %882 = vpow2.f32 %v751_v49  ;;  %v585_v49 = vlaneseq }
 0x107   : > { %v396_v54 = vadd.f32 1.0, %v871_v52 }
 0x108   : > { %v586_v52 = vshrl.u32 %v585_v49, 7 }
 0x109   : > { %v873_v55 = vpop.eup %872  ;;  %884 = vrcp.f32 %v396_v54  ;;  %v558_v54 = vld [vmem:[#allocation2] sm:$0x1] }
 0x10a   : > { %v875_v56 = vpop.eup %874  ;;  %886 = vrcp.f32 %v397_v53  ;;  %v399_v57 = vadd.f32 1.0, %v873_v55 }
 0x10b   : > { %v398_v58 = vadd.f32 1.0, %v875_v56  ;;  %v587_v56 = vsub.s32 0, %v586_v52 }
 0x10d   : > { %v877_v59 = vpop.eup %876  ;;  %888 = vrcp.f32 %v398_v58 }
 0x10e   : > { %v879_v60 = vpop.eup %878  ;;  %890 = vrcp.f32 %v399_v57  ;;  %v401_v63 = vadd.f32 1.0, %v877_v59 }
 0x10f   : > { %v881_v61 = vpop.eup %880 }
 0x110   : > { %v883_v62 = vpop.eup %882  ;;  %819 = vmatprep.mubr.msk.f32.mxu1 %vm240_vm1, %v881_v61 }
 0x111   : > { %v400_v0 = vadd.f32 1.0, %v883_v62  ;;  %820 = vmatmul.mubr.msk.f32.vlgmr.msra.gmra.mrb[0].mxu1 %vm240_vm1, %v879_v60 }
 0x113   : > { %v885_v1 = vpop.eup %884  ;;  %892 = vrcp.f32 %v400_v0 }
 0x114   : > { %v887_v2 = vpop.eup %886  ;;  %894 = vrcp.f32 %v401_v63  ;;  %822 = vmatprep.mubr.msk.f32.mxu1 %vm240_vm1, %v885_v1 }
 0x115   : > { %823 = vmatmul.mubr.msk.f32.gmra.mrb[2].mxu1 %vm240_vm1, %v887_v2 }
 0x117   : > { %v889_v3 = vpop.eup %888 }
 0x118   : > { %v891_v4 = vpop.eup %890  ;;  %825 = vmatprep.mubr.msk.f32.mxu1 %vm240_vm1, %v889_v3 }
 0x119   : > { %826 = vmatmul.mubr.msk.f32.gmra.mrb[4].mxu1 %vm240_vm1, %v891_v4 }
 0x11d   : > { %v893_v5 = vpop.eup %892 }
 0x11e   : > { %v895_v6 = vpop.eup %894  ;;  %828 = vmatprep.mubr.msk.f32.mxu1 %vm240_vm1, %v893_v5 }
 0x11f   : > { %829 = vmatmul.mubr.msk.f32.gmra.mrb[6].mxu1 %vm240_vm1, %v895_v6 }
 0x1e4   : > { %v821_v8 = vpop.f32.mrb[0].mxu1 }
 0x1e5   : > { %v519_v16 = vpop.f32.mrb[1].mxu1  ;;  %v525_v20 = vadd.f32 %v821_v8, %v753_v17 }
 0x1e6   : > { %v520_v21 = vadd.f32 %v753_v17, %v519_v16 }
 0x1e7   : > { %v560_v26 = vsel %vm240_vm1, %v525_v20, -inf }
 0x1e8   : > { %v824_v18 = vpop.f32.mrb[2].mxu1  ;;  %v559_v28 = vsel %vm240_vm1, %v520_v21, -inf }
 0x1e9   : > { %v529_v19 = vpop.f32.mrb[3].mxu1  ;;  %v535_v31 = vadd.f32 %v824_v18, %v753_v17 }
 0x1ea   : > { %v530_v33 = vadd.f32 %v753_v17, %v529_v19 }
 0x1eb   : > { %v562_v39 = vsel %vm240_vm1, %v535_v31, -inf }
 0x1ec   : > { %v827_v22 = vpop.f32.mrb[4].mxu1  ;;  %v561_v41 = vsel %vm240_vm1, %v530_v33, -inf }
 0x1ed   : > { %v545_v23 = vadd.f32 %v827_v22, %v753_v17  ;;  %v539_v24 = vpop.f32.mrb[5].mxu1 }
 0x1ee   : > { %v540_v25 = vadd.f32 %v753_v17, %v539_v24 }
 0x1ef   : > { %v565_v27 = vsel %vm240_vm1, %v545_v23, -inf }
 0x1f0   : > { %v566_v29 = vmax.f32 %v560_v26, %v565_v27  ;;  %v563_v30 = vsel %vm240_vm1, %v540_v25, -inf }
 0x1f1   : > { %v564_v32 = vmax.f32 %v559_v28, %v563_v30 }
 0x1f2   : > { %v830_v34 = vpop.f32.mrb[6].mxu1 }
 0x1f3   : > { %v571_v35 = vmax.f32 %v564_v32, %v566_v29  ;;  %v555_v36 = vadd.f32 %v830_v34, %v753_v17  ;;  %v549_v37 = vpop.f32.mrb[7].mxu1 }
 0x1f4   : > { %v550_v38 = vadd.f32 %v753_v17, %v549_v37 }
 0x1f5   : > { %v569_v40 = vsel %vm240_vm1, %v555_v36, -inf }
 0x1f6   : > { %v570_v42 = vmax.f32 %v562_v39, %v569_v40  ;;  %v567_v43 = vsel %vm240_vm1, %v550_v38, -inf }
 0x1f7   : > { %v568_v44 = vmax.f32 %v561_v41, %v567_v43 }
 0x1f9   : > { %v572_v45 = vmax.f32 %v568_v44, %v570_v42 }
 0x1fb   : > { %v573_v46 = vmax.f32 %v571_v35, %v572_v45 }
 0x1fd   : > { %v574_v47 = vrot.slane %v573_v46, 4 }
 0x1ff   : > { %v575_v48 = vmax.f32 %v573_v46, %v574_v47 }
 0x201   : > { %v576_v50 = vrot.slane %v575_v48, 2 }
 0x203   : > { %v577_v51 = vmax.f32 %v575_v48, %v576_v50 }
 0x205   : > { %v578_v53 = vrot.slane %v577_v51, 1 }
 0x207   : > { %v579_v55 = vmax.f32 %v577_v51, %v578_v53 }
 0x209   : > { %v580_v57 = vmax.f32 %v558_v54, %v579_v55 }
 0x20b   : > { %v588_v58 = vrot.slane %v580_v57, %v587_v56  ;;  %673 = vst.msk [vmem:[#allocation2] sm:$0x1] %vm638_vm2, %v580_v57 }
 0x20d   : > { %v590_v59 = vsub.f32 %v520_v21, %v588_v58  ;;  %v591_v60 = vsub.f32 %v525_v20, %v588_v58  ;;  %v592_v61 = vsub.f32 %v530_v33, %v588_v58  ;;  %v593_v62 = vsub.f32 %v535_v31, %v588_v58 }
 0x20e   : > { %v594_v63 = vsub.f32 %v540_v25, %v588_v58  ;;  %v595_v0 = vsub.f32 %v545_v23, %v588_v58  ;;  %v596_v1 = vsub.f32 %v550_v38, %v588_v58  ;;  %v597_v2 = vsub.f32 %v555_v36, %v588_v58 }
 0x20f   : > { %v598_v3 = vmul.f32 1.442695, %v590_v59  ;;  %v600_v4 = vmul.f32 1.442695, %v591_v60  ;;  %v602_v5 = vmul.f32 1.442695, %v592_v61  ;;  %v581_v36 = vsub.f32 %v558_v54, %v580_v57 }
 0x210   : > { %v604_v6 = vmul.f32 1.442695, %v593_v62  ;;  %v606_v8 = vmul.f32 1.442695, %v594_v63  ;;  %v608_v16 = vmul.f32 1.442695, %v595_v0 }
 0x211   : > { %896 = vpow2.f32 %v598_v3  ;;  %v610_v17 = vmul.f32 1.442695, %v596_v1  ;;  %v612_v18 = vmul.f32 1.442695, %v597_v2  ;;  %v582_v46 = vmul.f32 1.442695, %v581_v36 }
 0x212   : > { %898 = vpow2.f32 %v600_v4  ;;  %v614_v3 = vld [vmem:[#allocation3] sm:$0x1] }
 0x213   : > { %900 = vpow2.f32 %v602_v5 }
 0x214   : > { %902 = vpow2.f32 %v604_v6  ;;  %v640_v6 = vld [vmem:[#allocation4] sm:$0x1] }
 0x215   : > { %904 = vpow2.f32 %v606_v8 }
 0x216   : > { %906 = vpow2.f32 %v608_v16 }
 0x217   : > { %908 = vpow2.f32 %v610_v17 }
 0x218   : > { %910 = vpow2.f32 %v612_v18 }
 0x219   : > { %912 = vpow2.f32 %v582_v46 }
 0x21b   : > { %v897_v19 = vpop.eup %896 }
 0x21c   : > { %v899_v20 = vpop.eup %898  ;;  %v616_v21 = vsel %vm240_vm1, %v897_v19, 0.0  ;;  %v642_v22 = vmul.f32 %v897_v19, %v1017_v7 }
 0x21d   : > { %v901_v23 = vpop.eup %900  ;;  %v617_v24 = vsel %vm240_vm1, %v899_v20, 0.0  ;;  %v643_v25 = vmul.f32 %v899_v20, %v1022_v9 }
 0x21e   : > { %v903_v26 = vpop.eup %902  ;;  %v618_v27 = vadd.f32 %v617_v24, %v616_v21  ;;  %v644_v28 = vmul.f32 %v901_v23, %v1025_v10  ;;  %v650_v29 = vsel %vm240_vm1, %v642_v22, 0.0  ;;  %v619_v31 = vsel %vm240_vm1, %v901_v23, 0.0 }
 0x21f   : > { %v905_v30 = vpop.eup %904  ;;  %v645_v32 = vmul.f32 %v903_v26, %v1032_v11  ;;  %v651_v33 = vsel %vm240_vm1, %v643_v25, 0.0  ;;  %v621_v37 = vsel %vm240_vm1, %v903_v26, 0.0 }
 0x220   : > { %v907_v34 = vpop.eup %906  ;;  %v620_v7 = vadd.f32 %v619_v31, %v618_v27  ;;  %v652_v35 = vadd.f32 %v651_v33, %v650_v29  ;;  %v646_v9 = vmul.f32 %v905_v30, %v1035_v12  ;;  %v653_v38 = vsel %vm240_vm1, %v644_v28, 0.0 }
 0x221   : > { %v909_v10 = vpop.eup %908  ;;  %v623_v41 = vsel %vm240_vm1, %v905_v30, 0.0  ;;  %v647_v42 = vmul.f32 %v907_v34, %v1042_v13  ;;  %v655_v11 = vsel %vm240_vm1, %v645_v32, 0.0  ;;  %v625_v47 = vsel %vm240_vm1, %v907_v34, 0.0 }
 0x222   : > { %v622_v39 = vadd.f32 %v621_v37, %v620_v7  ;;  %v654_v40 = vadd.f32 %v653_v38, %v652_v35  ;;  %v911_v43 = vpop.eup %910  ;;  %v648_v48 = vmul.f32 %v909_v10, %v1045_v14  ;;  %v657_v12 = vsel %vm240_vm1, %v646_v9, 0.0 }
 0x223   : > { %v627_v51 = vsel %vm240_vm1, %v909_v10, 0.0  ;;  %v649_v52 = vmul.f32 %v911_v43, %v1052_v15  ;;  %v659_v13 = vsel %vm240_vm1, %v647_v42, 0.0  ;;  %v629_v55 = vsel %vm240_vm1, %v911_v43, 0.0  ;;  %v913_v2 = vpop.eup %912 }
 0x224   : > { %v624_v44 = vadd.f32 %v623_v41, %v622_v39  ;;  %v656_v45 = vadd.f32 %v655_v11, %v654_v40  ;;  %v661_v56 = vsel %vm240_vm1, %v648_v48, 0.0  ;;  %v615_v8 = vmul.f32 %v913_v2, %v614_v3 }
 0x225   : > { %v663_v14 = vsel %vm240_vm1, %v649_v52, 0.0  ;;  %v641_v19 = vmul.f32 %v913_v2, %v640_v6 }
 0x226   : > { %v626_v49 = vadd.f32 %v625_v47, %v624_v44  ;;  %v658_v50 = vadd.f32 %v657_v12, %v656_v45 }
 0x228   : > { %v628_v53 = vadd.f32 %v627_v51, %v626_v49  ;;  %v660_v54 = vadd.f32 %v659_v13, %v658_v50 }
 0x22a   : > { %v630_v57 = vadd.f32 %v629_v55, %v628_v53  ;;  %v662_v58 = vadd.f32 %v661_v56, %v660_v54 }
 0x22c   : > { %v631_v59 = vrot.slane %v630_v57, 4  ;;  %v664_v60 = vadd.f32 %v663_v14, %v662_v58 }
 0x22e   : > { %v632_v61 = vadd.f32 %v631_v59, %v630_v57  ;;  %v665_v62 = vrot.slane %v664_v60, 4 }
 0x230   : > { %v633_v63 = vrot.slane %v632_v61, 2  ;;  %v666_v0 = vadd.f32 %v665_v62, %v664_v60 }
 0x232   : > { %v634_v15 = vadd.f32 %v633_v63, %v632_v61  ;;  %v667_v1 = vrot.slane %v666_v0, 2 }
 0x234   : > { %v635_v4 = vrot.slane %v634_v15, 1  ;;  %v668_v5 = vadd.f32 %v667_v1, %v666_v0 }
 0x236   : > { %v636_v16 = vadd.f32 %v635_v4, %v634_v15  ;;  %v669_v17 = vrot.slane %v668_v5, 1  ;;  %677 = sbr.rel (%p762_p5) target bundleno = 592 (0x250), region = 48 }
 0x238   : > { %v637_v18 = vadd.f32 %v636_v16, %v615_v8  ;;  %v670_v20 = vadd.f32 %v669_v17, %v668_v5 }
 0x23a   : > { %639 = vst.msk [vmem:[#allocation3] sm:$0x1] %vm638_vm2, %v637_v18  ;;  %v671_v21 = vadd.f32 %v670_v20, %v641_v19 }
 0x23c   : > { %672 = vst.msk [vmem:[#allocation4] sm:$0x1] %vm638_vm2, %v671_v21 }
 0x241   : > { %v679_v22 = vld [vmem:[#allocation3] sm:$0x1] }
 0x242   : > { %914 = vrcp.f32 %v679_v22 }
 0x243   : > { %v678_v23 = vld [vmem:[#allocation4] sm:$0x1] }
 0x24c   : > { %v915_v24 = vpop.eup %914 }
 0x24d   : > { %v681_v25 = vmul.f32 %v915_v24, %v678_v23 }
 0x24f   : > { %682 = vst.msk [vmem:[#allocation5] sm:$0x1] %vm638_vm2, %v681_v25 }
 0x250 PF: > { %p851_p6 = scmp.eq.s32.totalorder %s993_s19, 3  ;;  %s956_s22 = smov [#allocation5]  }
 0x251   : > { %s690_s23 = sshll.u32 %s956_s22, 4  ;;  %s691_s23 = int_to_ptr.vmem [resolvable:$true] %s690_s23 }
 0x252   : > { %s916_s24 = scalar_lea.vmem %s691_s23, 16  ;;  %s922_s25 = scalar_lea.vmem %s691_s23, 32 }
 0x253   : > { %p917_p7 = scmp.ne.s32.totalorder %s691_s23, %s916_s24  ;;  %p923_p10 = scmp.lt.s32.totalorder %s691_s23, %s691_s23 }
 0x254   : > { %p924_p11 = scmp.lt.s32.totalorder %s922_s25, %s916_s24 }
 0x255   : > { %p918_p8 = pnand %p917_p7, %p851_p6 }
 0x256   : > { %p925_p12 = por %p924_p11, %p923_p10 }
 0x257   : > { %p919_p9 = pneg %p918_p8 }
 0x259   : > { %p926_p13 = pnand %p925_p12, %p919_p9 }
 0x25b   : > { %929 = shalt.err (!%p926_p13)
}
 0x25c   : > { %s930_s28 = scalar_lea.hbm %s1150_s5, 16 }
 0x25d   : > { %p931_p0 = scmp.ne.s32.totalorder %s1150_s5, %s930_s28  ;;  %p936_p3 = scmp.lt.u32.totalorder %s930_s28, %s1150_s5 }
 0x25f   : > { %p932_p1 = pnand %p931_p0, %p851_p6 }
 0x261   : > { %p933_p2 = pneg %p932_p1 }
 0x263   : > { %p938_p4 = pnand %p936_p3, %p933_p2 }
 0x265   : > { %941 = shalt.err (!%p938_p4)
}
 0x266   : > { %848 = dma.vmem_to_hbm [thread:$0]  (%p851_p6), %s691_s23, 16, %s1150_s5, [#allocation6]  }
 0x267   : > { %947 = dma.done.wait (%p851_p6), [#allocation6], 16  }
 0x268   : > { %949 = vsyncadd (%p851_p6), [#allocation6], 4294967280 }
 0x269 PF: > { %s16_s18 = sadd.s32 1, %s952_s18  }
 0x26a   : > { %p13_p5 = scmp.ge.s32.totalorder %s16_s18, 6  }
 0x26c   :  { %15 = sbr.rel (!%p13_p5) target bundleno = 1 (0x1), region = 75 }
 0x273   :  { %703 = vsyncpa [#allocation6], 1 }
 0x274   :  { %705 = vsyncpa [#allocation6 + $0x1], 1 }

</bundles_post_ra>
